<compile_context>
chip_gen: v7x
topology: tpu7x:2x2x1
jax: 0.10.0
libtpu: 0.0.40
codegen_flags: <defaults>
</compile_context>

<pallas_src>
import jax
import jax.numpy as jnp
from jax.experimental import pallas as pl
from jax.experimental.pallas import tpu as pltpu

_LANE = 128


def _build_pe(d_model: int, max_seq_len: int, dtype=jnp.float32) -> jnp.ndarray:
    """Sinusoidal positional-encoding table, shape (1, max_seq_len, d_model).

    Built in f32 and cast ONCE here ("module init"), so the hot path never
    re-reads / re-casts the table. Handles odd d_model correctly.
    """
    position = jnp.arange(0, max_seq_len, dtype=jnp.float32)[:, None]        # (S, 1)
    div_term = jnp.exp(
        jnp.arange(0, d_model, 2, dtype=jnp.float32)
        * (-jnp.log(jnp.float32(10000.0)) / d_model)
    )                                                                         # (ceil(D/2),)
    angles = position * div_term                                              # (S, ceil(D/2))
    pe = jnp.zeros((max_seq_len, d_model), dtype=jnp.float32)
    pe = pe.at[:, 0::2].set(jnp.sin(angles))
    pe = pe.at[:, 1::2].set(jnp.cos(angles)[:, : d_model // 2])
    return pe[None, :, :].astype(dtype)                                       # (1, S, D)


def _add_pe_kernel(x_ref, pe_ref, o_ref):
    # x_ref / pe_ref / o_ref: identical (1, ts, td) tiles -> pure elementwise
    # VPU add, no MXU/XLU work and no in-kernel broadcast.
    o_ref[...] = x_ref[...] + pe_ref[...]


def _round_up(x: int, m: int) -> int:
    return -(-x // m) * m


def _native_sublane(dtype) -> int:
    # f32 -> 8, bf16 -> 16, int8/fp8 -> 32 (packed sublane tile).
    return max(8, 32 // jnp.dtype(dtype).itemsize)


def _divisor_tile(total: int, unit: int, cap_elems: int) -> int:
    """Largest multiple of `unit` that divides `total` and is <= cap (>= unit).

    If `total` is not a multiple of `unit`, returns `total` (take the full dim;
    Mosaic pads it to the native tile)."""
    if total % unit != 0:
        return total
    t = min(total, max(unit, (cap_elems // unit) * unit))
    while t > unit and total % t != 0:
        t -= unit
    return t


def _vmem_capacity_bytes() -> int:
    try:
        info = pltpu.get_tpu_info()
        cap = getattr(info, "vmem_capacity_bytes", None)
        if cap:
            return int(cap)
    except Exception:
        pass
    return 64 * 1024 * 1024  # conservative default (v7x per-TensorCore VMEM)


def positional_encoding(x: jnp.ndarray, pe: jnp.ndarray,
                        *, vmem_cap_bytes: int | None = None) -> jnp.ndarray:
    """x: (B, S, D), pe: (1, S_pe >= S, D) -> x + pe[:, :S], shape (B, S, D)."""
    B, S, D = x.shape
    assert pe.ndim == 3 and pe.shape[0] == 1 and pe.shape[2] == D and pe.shape[1] >= S
    if pe.shape[1] != S:
        pe = pe[:, :S, :]
    if pe.dtype != x.dtype:
        # Fallback only: for the hot path, build pe in the activation dtype at
        # module init (as __main__ does) so this cast never runs per call.
        pe = pe.astype(x.dtype)

    itemsize = jnp.dtype(x.dtype).itemsize
    n_sub = _native_sublane(x.dtype)

    if vmem_cap_bytes is None:
        vmem_cap_bytes = _vmem_capacity_bytes()
    # 6 live blocks per step: {x, pe, out} x double-buffered, each padded to the
    # native (n_sub, 128) tile. Keep the padded total well under the limit.
    total_budget = min(vmem_cap_bytes * 3 // 8, 48 * 1024 * 1024)
    per_buf = max(total_budget // 6, 8 * _LANE * itemsize)

    # Lane (last-dim) tile: a multiple of 128 dividing D when possible, sized
    # assuming the minimum n_sub rows; otherwise the full (small) D.
    td = _divisor_tile(D, _LANE, per_buf // (n_sub * itemsize))
    td_pad = _round_up(td, _LANE)
    # Sublane tile over the SEQUENCE axis (dtype-native multiple), capped by the
    # padded-lane footprint so the block stays inside the per-buffer budget.
    ts = _divisor_tile(S, n_sub, per_buf // (td_pad * itemsize))

    n_s, n_d = S // ts, D // td

    # v7x megacore: guarantee >= 2 independent grid tiles so neither TC idles.
    if B * n_s * n_d < 2:
        new_td = _divisor_tile(D, _LANE, max(_LANE, td // 2))
        if new_td < td:
            td, n_d = new_td, D // new_td
        else:
            new_ts = _divisor_tile(S, n_sub, max(n_sub, ts // 2))
            if new_ts < ts:
                ts, n_s = new_ts, S // new_ts

    grid = (n_s, n_d, B)  # batch innermost: pe block index constant -> no re-DMA

    out = pl.pallas_call(
        _add_pe_kernel,
        out_shape=jax.ShapeDtypeStruct((B, S, D), x.dtype),
        grid_spec=pltpu.PrefetchScalarGridSpec(
            num_scalar_prefetch=0,
            grid=grid,
            in_specs=[
                pl.BlockSpec((1, ts, td), lambda s, d, b: (b, s, d)),  # x tile
                pl.BlockSpec((1, ts, td), lambda s, d, b: (0, s, d)),  # pe tile (reused over batch)
            ],
            out_specs=pl.BlockSpec((1, ts, td), lambda s, d, b: (b, s, d)),
        ),
        compiler_params=pltpu.CompilerParams(
            # Every tile is independent (elementwise add), so all axes are
            # parallel; measured impact of parallel-vs-arbitrary is ~0, but this
            # lets v7x split any axis across its two TensorCores.
            dimension_semantics=("parallel", "parallel", "parallel"),
            vmem_limit_bytes=min(vmem_cap_bytes // 2, 64 * 1024 * 1024),
        ),
    )(x, pe)

    return out


if __name__ == "__main__":
    # Small shapes consistent with the module: batch=2, max_seq_len=8, d_model=32.
    B, S, D = 2, 8, 32
    key = jax.random.PRNGKey(0)
    x = jax.random.normal(key, (B, S, D), dtype=jnp.float32)

    # "Module init": build pe once, already in the activation dtype.
    pe = _build_pe(d_model=D, max_seq_len=S, dtype=x.dtype)

    out = positional_encoding(x, pe)
    out = jax.block_until_ready(out)

    ref = x + pe
    assert out.shape == (B, S, D)
    assert out.dtype == x.dtype
    assert jnp.allclose(out, ref, atol=1e-6), "mismatch vs reference"

    print("KERNEL_OK")
</pallas_src>

<mosaic_0001>
module attributes {stable_mosaic.version = 11 : i64} {
  func.func @_add_pe_kernel(%arg0: i32, %arg1: i32, %arg2: i32, %arg3: memref<1x8x32xf32, #tpu.memory_space<vmem>>, %arg4: memref<1x8x32xf32, #tpu.memory_space<vmem>>, %arg5: memref<1x8x32xf32, #tpu.memory_space<vmem>>) attributes {dimension_semantics = [#tpu.dimension_semantics<parallel>, #tpu.dimension_semantics<parallel>, #tpu.dimension_semantics<parallel>], iteration_bounds = array<i64: 1, 1, 2>, scalar_prefetch = 0 : i64, scratch_operands = 0 : i64, tpu.core_type = #tpu.core_type<tc>, window_params = [{transform_indices = @transform_0, window_bounds = array<i64: 1, 8, 32>}, {transform_indices = @transform_1, window_bounds = array<i64: 1, 8, 32>}, {transform_indices = @transform_2, window_bounds = array<i64: 1, 8, 32>}]} {
    %c0 = arith.constant 0 : index
    %c0_0 = arith.constant 0 : index
    %c0_1 = arith.constant 0 : index
    %0 = vector.load %arg3[%c0, %c0_0, %c0_1] : memref<1x8x32xf32, #tpu.memory_space<vmem>>, vector<1x8x32xf32>
    %c0_2 = arith.constant 0 : index
    %c0_3 = arith.constant 0 : index
    %c0_4 = arith.constant 0 : index
    %1 = vector.load %arg4[%c0_2, %c0_3, %c0_4] : memref<1x8x32xf32, #tpu.memory_space<vmem>>, vector<1x8x32xf32>
    %2 = arith.addf %0, %1 : vector<1x8x32xf32>
    %c0_5 = arith.constant 0 : index
    %c0_6 = arith.constant 0 : index
    %c0_7 = arith.constant 0 : index
    %3 = vector.load %arg5[%c0_5, %c0_6, %c0_7] : memref<1x8x32xf32, #tpu.memory_space<vmem>>, vector<1x8x32xf32>
    tpu.vector_store %arg5[%c0_5, %c0_6, %c0_7], %2 {strides = array<i32>} : memref<1x8x32xf32, #tpu.memory_space<vmem>>, vector<1x8x32xf32>,
    return
  }
  func.func @transform_0(%arg0: i32, %arg1: i32, %arg2: i32) -> (i32, i32, i32) {
    %c0_i32 = arith.constant 0 : i32
    return %arg2, %arg0, %arg1 : i32, i32, i32
  }
  func.func @transform_1(%arg0: i32, %arg1: i32, %arg2: i32) -> (i32, i32, i32) {
    %c0_i32 = arith.constant 0 : i32
    %c0_i32_0 = arith.constant 0 : i32
    return %c0_i32, %arg0, %arg1 : i32, i32, i32
  }
  func.func @transform_2(%arg0: i32, %arg1: i32, %arg2: i32) -> (i32, i32, i32) {
    %c0_i32 = arith.constant 0 : i32
    return %arg2, %arg0, %arg1 : i32, i32, i32
  }
}

</mosaic_0001>

<bundles_post_ra>
// kernel: tpu_custom_call.1
= control target key start
LH: loop header
LB: loop body
LE: loop exit
PB: predicated region body
PF: predicated region fallthrough
CT: control target
= control target key end

     0   :  { %7 = vsyncpa [#allocation3], 0  ;;  %s798_s0 = inlined_call_operand.hbm [shape: f32[2,8,32], index: 0, kind: input, shape index: {}]   ;;  %s799_s1 = inlined_call_operand.hbm [shape: f32[1,8,32], index: 1, kind: input, shape index: {}]   ;;  %s800_s2 = inlined_call_operand.hbm [shape: f32[2,8,32], index: 2, kind: output, shape index: {}]  }
   0x1   :  { %9 = vsyncpa [#allocation3 + $0x1], 0 }
   0x2   :  { %10 = vsyncpa [#allocation6], 0 }
   0x3   :  { %11 = vsyncpa [#allocation4], 0 }
   0x4   :  { %13 = vsyncpa [#allocation4 + $0x1], 0  ;;  %s582_s9 = smov 0   ;;  %s584_s10 = smov 0  }
   0x5   :  { %s586_s11 = smov 0   ;;  %s588_s12 = smov 0  }
   0x6   :  { %s590_s13 = smov 0   ;;  %s592_s14 = smov 0  }
   0x7 LB: > { %s330_s15 = sadd.s32 4294967295, %s562_s14   ;;  %s331_s16 = sadd.s32 4294967294, %s562_s14   ;;  %s562_s14 = sphi %s592_s14, %s19_s14   ;;  %s558_s13 = sphi %s590_s13, %s825_s13   ;;  %s554_s12 = sphi %s588_s12, %s824_s12   ;;  %s550_s11 = sphi %s586_s11, %s823_s11   ;;  %s546_s10 = sphi %s584_s10, %s822_s10   ;;  %s542_s9 = sphi %s582_s9, %s821_s9  }
   0x8   : > { %p62_p0 = scmp.ne.s32.totalorder %s546_s10, %s542_s9  ;;  %p616_p1 = scmp.eq.s32.totalorder %s330_s15, 0 }
   0x9   : > { %p620_p2 = scmp.eq.s32.totalorder %s330_s15, 1  ;;  %p124_p3 = scmp.eq.s32.totalorder %s331_s16, 1 }
   0xa   : > { %s805_s17 = scalar_select %p616_p1, 1, 0 }
   0xb   : > { %s806_s18 = scalar_select %p620_p2, 1, 0 }
   0xc   : > { %p626_p4 = por %p616_p1, %p62_p0  ;;  %p332_p5 = scmp.ge.s32.totalorder %s562_s14, 1 }
   0xd   : > { %p631_p6 = por %p124_p3, %p62_p0  ;;  %p131_p7 = scmp.lt.s32.totalorder %s562_s14, 3 }
   0xe   : > { %s807_s19 = scalar_select %p626_p4, 1, 0 }
   0xf   : > { %s808_s20 = scalar_select %p631_p6, 1, 0 }
  0x10   : > { %p636_p8 = pnand %p332_p5, %p131_p7  ;;  %s564_s22 = smov [#allocation5]  }
  0x11   : > { %s147_s23 = sshll.u32 %s564_s22, 4  ;;  %s31_s25 = sadd.s32 1, %s558_s13  ;;  %s148_s23 = int_to_ptr.vmem [resolvable:$true] %s147_s23 }
  0x12   : > { %s809_s21 = scalar_select %p636_p8, 1, 0 }
  0x13   : > { %p353_p10 = pneg %p636_p8  ;;  %s49_s26 = sadd.s32 1, %s550_s11 }
  0x14   : > { %p651_p12 = scmp.ge.s32.totalorder %s31_s25, 2  ;;  %s418_s30 = scalar_lea.hbm %s799_s1, 128 }
  0x15   : > { %p645_p11 = pnand %p353_p10, %p616_p1  ;;  %p419_p13 = scmp.ne.s32.totalorder %s799_s1, %s418_s30 }
  0x16   : > { %s811_s27 = scalar_select %p651_p12, 1, 0 }
  0x17   : > { %p420_p0 = pneg %p645_p11  ;;  %p425_p7 = scmp.lt.u32.totalorder %s418_s30, %s799_s1 }
  0x19   : > { %p421_p3 = pnand %p420_p0, %p419_p13 }
  0x1b   : > { %p422_p5 = pneg %p421_p3 }
  0x1d   : > { %p427_p10 = pnand %p425_p7, %p422_p5 }
  0x1f   : > { %430 = shalt.err (!%p427_p10)
}
  0x20   : > { %s431_s7 = scalar_lea.vmem %s148_s23, 128  ;;  %p439_p4 = scmp.lt.s32.totalorder %s148_s23, %s148_s23 }
  0x21   : > { %p432_p9 = scmp.ne.s32.totalorder %s148_s23, %s431_s7  ;;  %p440_p8 = scmp.lt.s32.totalorder %s431_s7, %s431_s7 }
  0x23   : > { %p434_p6 = pnand %p432_p9, %p420_p0  ;;  %p441_p2 = por %p440_p8, %p439_p4 }
  0x25   : > { %p435_p1 = pneg %p434_p6 }
  0x27   : > { %p442_p12 = pnand %p441_p2, %p435_p1 }
  0x29   : > { %445 = shalt.err (!%p442_p12)
}
  0x2a   : > { %356 = dma.hbm_to_vmem [thread:$0]  (!%p645_p11), %s799_s1, 128, %s148_s23, [#allocation6]  }
  0x2b   : > { %p812_p4 = scmp.ne.s32.totalorder %s811_s27, 0  ;;  %p56_p1 = scmp.ne.s32.totalorder %s550_s11, %s546_s10 }
  0x2c   : > { %p57_p2 = scmp.eq.s32.totalorder %s562_s14, 0  ;;  %p366_p6 = scmp.lt.s32.totalorder %s562_s14, 2 }
  0x2d   : > { %s827_s25 = smov (%p812_p4, %s31_s25), 0  ;;  %p813_p12 = scmp.ne.s32.totalorder %s806_s18, 0 }
  0x2e   : > { %s42_s16 = ssub.s32 %s558_s13, %s827_s25  ;;  %p58_p9 = por %p57_p2, %p56_p1 }
  0x2f   : > { %p47_p8 = scmp.eq.s32.totalorder %s42_s16, 0  ;;  %p683_p13 = por %p813_p12, %p56_p1 }
  0x30   : > { %s158_s24 = sand.u32 1, %s550_s11   ;;  %s336_s27 = sshll.u32 %s558_s13, 7 }
  0x31   : > { %s691_s28 = scalar_select %p47_p8, %s550_s11, %s49_s26  }
  0x32   : > { %s335_s23 = sshll.u32 %s158_s24, 3  ;;  %s697_s3 = scalar_lea.hbm %s798_s0, %s336_s27 }
  0x33   : > { %s162_s18 = scalar_lea.vmem [#allocation2], %s335_s23  ;;  %p701_p11 = pnand %p366_p6, %p58_p9 }
  0x34   : > { %s171_s4 = sshll.u32 %s162_s18, 4  ;;  %s159_s26 = scalar_lea.sflag [#allocation3], %s158_s24  ;;  %s699_s4 = int_to_ptr.vmem [resolvable:$true] %s171_s4 }
  0x35   : > { %s446_s6 = scalar_lea.hbm %s697_s3, 128  ;;  %p448_p3 = pneg %p701_p11 }
  0x36   : > { %p447_p0 = scmp.ne.s32.totalorder %s697_s3, %s446_s6  ;;  %s451_s15 = scalar_lea.hbm %s798_s0, 256 }
  0x37   : > { %p452_p10 = scmp.lt.u32.totalorder %s697_s3, %s798_s0  ;;  %p453_p4 = scmp.lt.u32.totalorder %s451_s15, %s446_s6 }
  0x38   : > { %p449_p5 = pnand %p448_p3, %p447_p0  ;;  %p455_p2 = scmp.lt.u32.totalorder %s446_s6, %s697_s3 }
  0x39   : > { %p454_p1 = por %p453_p4, %p452_p10 }
  0x3a   : > { %p450_p7 = pneg %p449_p5 }
  0x3b   : > { %p456_p6 = por %p455_p2, %p454_p1 }
  0x3d   : > { %p457_p8 = pnand %p456_p6, %p450_p7 }
  0x3f   : > { %460 = shalt.err (!%p457_p8)
}
  0x40   : > { %s461_s24 = scalar_lea.vmem %s699_s4, 128  ;;  %s565_s27 = smov [#allocation2]  }
  0x41   : > { %p462_p9 = scmp.ne.s32.totalorder %s699_s4, %s461_s24  ;;  %s466_s29 = sshll.u32 %s565_s27, 4  ;;  %s467_s29 = int_to_ptr.vmem [resolvable:$false] %s466_s29 }
  0x42   : > { %s468_s30 = scalar_lea.vmem %s467_s29, 256  ;;  %p469_p5 = scmp.lt.s32.totalorder %s699_s4, %s467_s29 }
  0x43   : > { %p464_p12 = pnand %p462_p9, %p448_p3  ;;  %p470_p10 = scmp.lt.s32.totalorder %s468_s30, %s461_s24 }
  0x45   : > { %p465_p0 = pneg %p464_p12  ;;  %p471_p4 = por %p470_p10, %p469_p5 }
  0x47   : > { %p472_p1 = pnand %p471_p4, %p465_p0 }
  0x49   : > { %475 = shalt.err (!%p472_p1)
}
  0x4a   : > { %360 = dma.hbm_to_vmem [thread:$0]  (!%p701_p11), %s697_s3, 128, %s699_s4, %s159_s26  }
  0x4b   : > { %p816_p7 = scmp.ne.s32.totalorder %s809_s21, 0 }
  0x4c   : > { %s733_s18 = sand.u32 (!%p816_p7), 1, %s546_s10   ;;  %p817_p3 = scmp.ne.s32.totalorder (!%p816_p7), %s807_s19, 0 }
  0x4d   : > { %180 = sbr.rel (%p816_p7) target bundleno = 113 (0x71), region = 28  ;;  %s338_s6 = sshll.u32 (!%p816_p7), %s733_s18, 3 }
  0x4e   : > { %s183_s7 = scalar_lea.sflag (!%p816_p7), [#allocation3], %s733_s18  ;;  %s186_s8 = scalar_lea.vmem (!%p816_p7), [#allocation2], %s338_s6 }
  0x54   : > { %529 = dma.done.wait (%p817_p3), %s183_s7, 128  }
  0x55   : > { %531 = vsyncadd (%p817_p3), %s183_s7, 4294967168  ;;  %p818_p2 = scmp.ne.s32.totalorder %s805_s17, 0 }
  0x57   : > { %533 = dma.done.wait (%p818_p2), [#allocation6], 128  }
  0x58   : > { %535 = vsyncadd (%p818_p2), [#allocation6], 4294967168  ;;  %s210_s21 = scalar_lea.vmem [#allocation7], %s338_s6  ;;  %s342_s4 = sshll.u32 %s554_s12, 7  ;;  %v211_v0 = vld [vmem:[%s186_s8] sm:$0xff]  ;;  %v212_v1 = vld [vmem:[#allocation5] sm:$0xff] }
  0x59   : > { %s232_s3 = sshll.u32 %s210_s21, 4  ;;  %vm214_vm0 = vcmask 261120   ;;  %v213_v2 = vadd.f32 %v212_v1, %v211_v0  ;;  %s751_s17 = scalar_lea.hbm %s800_s2, %s342_s4  ;;  %s746_s3 = int_to_ptr.vmem [resolvable:$true] %s232_s3 }
  0x5a   : > { %s217_s26 = scalar_lea.sflag [#allocation4], %s733_s18  ;;  %s476_s15 = scalar_lea.vmem %s746_s3, 128 }
  0x5b   : > { %215 = vst.msk [vmem:[%s210_s21] sm:$0xff] %vm214_vm0, %v213_v2  ;;  %p477_p11 = scmp.ne.s32.totalorder %s746_s3, %s476_s15  ;;  %s566_s12 = smov [#allocation7]  }
  0x5c   : > { %s480_s16 = sshll.u32 %s566_s12, 4  ;;  %s481_s16 = int_to_ptr.vmem [resolvable:$false] %s480_s16 }
  0x5d   : > { %p478_p6 = pnand %p477_p11, %p683_p13  ;;  %s482_s23 = scalar_lea.vmem %s481_s16, 256 }
  0x5e   : > { %p483_p9 = scmp.lt.s32.totalorder %s746_s3, %s481_s16  ;;  %p484_p12 = scmp.lt.s32.totalorder %s482_s23, %s476_s15 }
  0x5f   : > { %p479_p8 = pneg %p478_p6 }
  0x60   : > { %p485_p0 = por %p484_p12, %p483_p9 }
  0x62   : > { %p486_p5 = pnand %p485_p0, %p479_p8 }
  0x64   : > { %489 = shalt.err (!%p486_p5)
}
  0x65   : > { %s490_s24 = scalar_lea.hbm %s751_s17, 128  ;;  %s494_s30 = scalar_lea.hbm %s800_s2, 256 }
  0x66   : > { %p491_p10 = scmp.ne.s32.totalorder %s751_s17, %s490_s24  ;;  %p495_p7 = scmp.lt.u32.totalorder %s751_s17, %s800_s2 }
  0x67   : > { %p496_p3 = scmp.lt.u32.totalorder %s494_s30, %s490_s24  ;;  %p498_p11 = scmp.lt.u32.totalorder %s490_s24, %s751_s17 }
  0x68   : > { %p492_p4 = pnand %p491_p10, %p683_p13 }
  0x69   : > { %p497_p2 = por %p496_p3, %p495_p7 }
  0x6a   : > { %p493_p1 = pneg %p492_p4 }
  0x6b   : > { %p499_p6 = por %p498_p11, %p497_p2 }
  0x6d   : > { %p500_p8 = pnand %p499_p6, %p493_p1 }
  0x6f   : > { %503 = shalt.err (!%p500_p8)
}
  0x70   : > { %351 = dma.vmem_to_hbm [thread:$0]  (%p683_p13), %s746_s3, 128, %s751_s17, %s217_s26  }
  0x71 PF: > { %s244_s7 = sand.u32 1, %s542_s9   ;;  %p819_p9 = scmp.ne.s32.totalorder %s808_s20, 0 }
  0x72   : > { %p820_p12 = scmp.ge.s32.totalorder %s562_s14, 2  ;;  %s245_s8 = scalar_lea.sflag [#allocation4], %s244_s7 }
  0x74   : > { %p362_p0 = pnand %p820_p12, %p819_p9 }
  0x76   : > { %537 = dma.done.wait (!%p362_p0), %s245_s8, 128  }
  0x77   : > { %539 = vsyncadd (!%p362_p0), %s245_s8, 4294967168  ;;  %s19_s14 = sadd.s32 1, %s562_s14   ;;  %s821_s9 = smov %s546_s10 }
  0x78   : > { %p16_p5 = scmp.ge.s32.totalorder %s19_s14, 4   ;;  %s822_s10 = smov %s550_s11 }
  0x79   : > { %s823_s11 = smov %s691_s28  ;;  %s824_s12 = smov %s558_s13 }
  0x7a   : > { %s825_s13 = smov %s827_s25  ;;  %18 = sbr.rel (!%p16_p5) target bundleno = 7 (0x7), region = 78 }
  0x81   :  { %250 = vsyncpa [#allocation3], 1 }
  0x82   :  { %252 = vsyncpa [#allocation3 + $0x1], 1 }
  0x83   :  { %253 = vsyncpa [#allocation6], 1 }
  0x84   :  { %254 = vsyncpa [#allocation4], 1 }
  0x85   :  { %256 = vsyncpa [#allocation4 + $0x1], 1 }

</bundles_post_ra>
